<compile_context>
chip_gen: v7x
topology: tpu7x:2x2x1
jax: 0.10.0
libtpu: 0.0.40
codegen_flags: <defaults>
</compile_context>

<pallas_src>
import math
import functools

import jax
import jax.numpy as jnp
from jax.experimental import pallas as pl
from jax.experimental.pallas import tpu as pltpu


def _round_up(x, m):
    return (x + m - 1) // m * m


# ----------------------------------------------------------------------------- kernel
def self_attention_kernel(x_ref, mask_ref, bd_ref, wall_ref, ball_ref,
                          w1_ref, b1_ref, g1_ref, beta1_ref,
                          out_ref, *, seg, value_size, eps):
    # x_ref: (R, D) with R = batch_tile * S_pad flattened rows.
    x2 = x_ref[...]

    # --- fused projection: one lane-dense bf16 matmul for q / k / bias / v -------------
    proj = jnp.dot(x2.astype(jnp.bfloat16), wall_ref[...],
                   preferred_element_type=jnp.float32) + ball_ref[...]      # (R, cpad) f32

    q_aug = proj[:, 0:seg]                                # [queries, 1, 0...]      (R, 128)
    k_aug = proj[:, seg:2 * seg]                          # [keys/sqrt(K), bias, 0] (R, 128)
    values = proj[:, 2 * seg:2 * seg + value_size]        # (R, D)

    # --- flattened score matmul; block-diag mask zeroes cross-batch terms --------------
    # scores[i, j] = queries[i] . keys_scaled[j] + bias[j]
    scores = jnp.einsum('qc,kc->qk', q_aug.astype(jnp.bfloat16), k_aug.astype(jnp.bfloat16),
                        preferred_element_type=jnp.float32)                 # (R, R)
    probs = jax.nn.sigmoid(scores) * bd_ref[...]          # f32 sigmoid (EUP), exact 0/1 mask

    # per-key mask folded into values (R*D elements instead of R*R)
    v_masked = values * mask_ref[...]                      # (R, D) * (R, 1)

    attention = jnp.dot(probs.astype(jnp.bfloat16), v_masked.astype(jnp.bfloat16),
                        preferred_element_type=jnp.float32)                 # (R, D)

    # --- residual + LayerNorm1 (affine), one-pass variance with non-negative clamp -----
    h = x2 + attention
    mu = jnp.mean(h, axis=-1, keepdims=True)
    var = jnp.maximum(jnp.mean(h * h, axis=-1, keepdims=True) - mu * mu, 0.0)
    res = (h - mu) * jax.lax.rsqrt(var + eps) * g1_ref[...] + beta1_ref[...]

    # --- feed-forward + ReLU ------------------------------------------------------------
    ff = jnp.dot(res.astype(jnp.bfloat16), w1_ref[...],
                 preferred_element_type=jnp.float32) + b1_ref[...]
    ff = jnp.maximum(ff, 0.0)

    # --- residual + LayerNorm2 (no affine) ----------------------------------------------
    h2 = res + ff
    mu2 = jnp.mean(h2, axis=-1, keepdims=True)
    var2 = jnp.maximum(jnp.mean(h2 * h2, axis=-1, keepdims=True) - mu2 * mu2, 0.0)
    out_ref[...] = (h2 - mu2) * jax.lax.rsqrt(var2 + eps)


# ----------------------------------------------------------------------------- packing
def pack_params(params, *, input_size, key_size):
    """Pack key/query/value/bias projections into one lane-dense weight + bias.

    Segments are padded to 128 lanes so in-kernel slices fall on lane-tile boundaries:
      [0, K)            : query weights
      [K]               : zero weights, bias 1.0        (constant-one column)
      [seg, seg+K)      : key weights * sqrt(1/K)       (scale folded in)
      [seg+K]           : attention-bias weights
      [2*seg, 2*seg+D)  : value weights
    so that dot(q_segment[i], k_segment[j]) == queries[i].keys_scaled[j] + bias[j].
    """
    D, K = input_size, key_size
    seg = _round_up(K + 1, 128)                 # lane-tile aligned segment width
    cpad = _round_up(2 * seg + D, 128)
    scale = math.sqrt(1.0 / K)

    w_all = jnp.zeros((D, cpad), jnp.float32)
    w_all = w_all.at[:, 0:K].set(params["wq"])
    w_all = w_all.at[:, seg:seg + K].set(params["wk"] * scale)
    w_all = w_all.at[:, seg + K].set(params["wb"][:, 0])
    w_all = w_all.at[:, 2 * seg:2 * seg + D].set(params["wv"])

    b_all = jnp.zeros((1, cpad), jnp.float32)
    b_all = b_all.at[0, 0:K].set(params["bq"][0])
    b_all = b_all.at[0, K].set(1.0)
    b_all = b_all.at[0, seg:seg + K].set(params["bk"][0] * scale)
    b_all = b_all.at[0, seg + K].set(params["bb"][0, 0])
    b_all = b_all.at[0, 2 * seg:2 * seg + D].set(params["bv"][0])

    return w_all.astype(jnp.bfloat16), b_all, seg, cpad


# ----------------------------------------------------------------------------- sizing
def _vmem_ceiling_bytes():
    """~75% of the device's physical VMEM (48 MiB on v7x, 96 MiB on v5e/v6e)."""
    try:
        cap = getattr(pltpu.get_tpu_info(), "vmem_capacity_bytes", None)
        if cap:
            return int(0.75 * cap)
    except Exception:
        pass
    return 96 * 1024 * 1024


def _step_bytes(rows, D, cpad):
    streamed = 2 * (rows * D * 4 + rows * 4 + rows * D * 4)                    # x, mask, out
    consts = 2 * (D * cpad * 2 + cpad * 4 + rows * rows * 4 + D * D * 2 + 3 * D * 4)
    interm = rows * cpad * 4 + 2 * rows * rows * 4 + 6 * rows * D * 4
    return streamed + consts + interm


def _choose_batch_tile(B, S_pad, D, cpad, vmem_ceiling, row_target=256):
    for bt in range(B, 0, -1):
        if B % bt != 0:
            continue
        if B >= 2 and B // bt < 2:
            continue                         # keep >=2 grid steps for v7x's 2nd TensorCore
        if bt * S_pad > row_target:
            continue                         # target ~128-256 MXU rows per step
        if 2 * _step_bytes(bt * S_pad, D, cpad) > vmem_ceiling:
            continue                         # back off Bt rather than blow the VMEM budget
        return bt
    return 1


# ----------------------------------------------------------------------------- wrapper
def self_attention_pallas(x, mask, params, *, key_size, eps=1e-5, batch_tile=None):
    B, S, D = x.shape
    S_pad = _round_up(S, 8)

    w_all, b_all, seg, cpad = pack_params(params, input_size=D, key_size=key_size)
    w1 = params["w1"].astype(jnp.bfloat16)
    b1, g1, beta1 = params["b1"], params["g1"], params["beta1"]

    # Pad the sequence to a sublane multiple (padded keys masked out, padded query rows
    # sliced off below) instead of dropping to batch_tile=1.
    if S_pad != S:
        x = jnp.pad(x, ((0, 0), (0, S_pad - S), (0, 0)))
        mask = jnp.pad(mask, ((0, 0), (0, S_pad - S)))

    vmem_ceiling = _vmem_ceiling_bytes()
    if batch_tile is None:
        batch_tile = _choose_batch_tile(B, S_pad, D, cpad, vmem_ceiling)
    Bt = batch_tile
    assert B % Bt == 0
    rows = Bt * S_pad

    x_flat = x.reshape(B * S_pad, D).astype(jnp.float32)
    mask_col = mask.reshape(B * S_pad, 1).astype(jnp.float32)

    # Constant block-diagonal (same-batch) mask for the flattened score matmul.
    rb = jnp.arange(rows, dtype=jnp.int32) // S_pad
    bd = (rb[:, None] == rb[None, :]).astype(jnp.float32)            # (rows, rows)

    def const_spec(shape):
        nd = len(shape)
        return pl.BlockSpec(shape, lambda b, _nd=nd: (0,) * _nd)

    in_specs = [
        pl.BlockSpec((rows, D), lambda b: (b, 0)),   # x rows (flattened batch*seq)
        pl.BlockSpec((rows, 1), lambda b: (b, 0)),   # per-key mask column
        const_spec((rows, rows)),                    # block-diagonal batch mask
        const_spec((D, cpad)), const_spec((1, cpad)),  # packed projection W, b
        const_spec((D, D)), const_spec((1, D)),        # lin1 W, b
        const_spec((1, D)), const_spec((1, D)),        # norm1 gamma, beta
    ]

    vmem_limit = int(min(vmem_ceiling,
                         max(32 * 1024 * 1024, 4 * _step_bytes(rows, D, cpad))))

    kernel = functools.partial(self_attention_kernel, seg=seg, value_size=D, eps=eps)
    out_flat = pl.pallas_call(
        kernel,
        out_shape=jax.ShapeDtypeStruct((B * S_pad, D), jnp.float32),
        grid_spec=pltpu.PrefetchScalarGridSpec(
            num_scalar_prefetch=0,
            grid=(B // Bt,),
            in_specs=in_specs,
            out_specs=pl.BlockSpec((rows, D), lambda b: (b, 0)),
        ),
        compiler_params=pltpu.CompilerParams(
            dimension_semantics=("parallel",),       # independent tiles -> both v7x cores
            vmem_limit_bytes=vmem_limit,
        ),
    )(x_flat, mask_col, bd, w_all, b_all, w1, b1, g1, beta1)

    out = out_flat.reshape(B, S_pad, D)
    return out[:, :S, :] if S_pad != S else out


# ----------------------------------------------------------------------------- references
def self_attention_reference(x, mask, params, *, key_size, eps=1e-5):
    """Pure-JAX f32 reference mirroring the PyTorch forward exactly."""
    keys = (x @ params["wk"] + params["bk"]) * math.sqrt(1.0 / key_size)
    queries = x @ params["wq"] + params["bq"]
    values = x @ params["wv"] + params["bv"]
    biases = x @ params["wb"] + params["bb"]                       # (B, S, 1)
    scores = jnp.einsum("bik,bjk->bij", keys, queries) + biases    # (B, S, S)
    scores = jnp.transpose(scores, (0, 2, 1))
    scores = jax.nn.sigmoid(scores)
    scores = scores * mask[:, None, :]
    attention = jnp.einsum("bij,bjd->bid", scores, values)

    def layernorm(h, g=None, b=None):
        mu = h.mean(-1, keepdims=True)
        var = ((h - mu) ** 2).mean(-1, keepdims=True)
        y = (h - mu) / jnp.sqrt(var + eps)
        if g is not None:
            y = y * g + b
        return y

    res = layernorm(x + attention, params["g1"], params["beta1"])
    ff = jax.nn.relu(res @ params["w1"] + params["b1"])
    return layernorm(res + ff)


def self_attention_bf16_reference(x, mask, params, *, key_size, eps=1e-5):
    """Plain-JAX model of the kernel's exact math (same packing + bf16 MXU inputs)."""
    B, S, D = x.shape
    w_all, b_all, seg, _ = pack_params(params, input_size=D, key_size=key_size)
    x2 = x.reshape(B * S, D)
    proj = jnp.dot(x2.astype(jnp.bfloat16), w_all,
                   preferred_element_type=jnp.float32) + b_all
    q = proj[:, 0:seg]
    k = proj[:, seg:2 * seg]
    v = proj[:, 2 * seg:2 * seg + D]
    scores = jnp.einsum("qc,kc->qk", q.astype(jnp.bfloat16), k.astype(jnp.bfloat16),
                        preferred_element_type=jnp.float32)
    rb = jnp.arange(B * S) // S
    bd = (rb[:, None] == rb[None, :]).astype(jnp.float32)
    probs = jax.nn.sigmoid(scores) * bd
    vm = v * mask.reshape(B * S, 1)
    attn = jnp.dot(probs.astype(jnp.bfloat16), vm.astype(jnp.bfloat16),
                   preferred_element_type=jnp.float32)

    h = x2 + attn
    mu = jnp.mean(h, -1, keepdims=True)
    var = jnp.maximum(jnp.mean(h * h, -1, keepdims=True) - mu * mu, 0.0)
    res = (h - mu) * jax.lax.rsqrt(var + eps) * params["g1"] + params["beta1"]
    ff = jnp.maximum(jnp.dot(res.astype(jnp.bfloat16), params["w1"].astype(jnp.bfloat16),
                             preferred_element_type=jnp.float32) + params["b1"], 0.0)
    h2 = res + ff
    mu2 = jnp.mean(h2, -1, keepdims=True)
    var2 = jnp.maximum(jnp.mean(h2 * h2, -1, keepdims=True) - mu2 * mu2, 0.0)
    return ((h2 - mu2) * jax.lax.rsqrt(var2 + eps)).reshape(B, S, D)


def init_params(key, input_size, key_size):
    """Deterministic PyTorch-style (uniform +/- 1/sqrt(fan_in)) init; weights stored (in, out)."""
    D, K = input_size, key_size
    ks = jax.random.split(key, 10)

    def lin(kw, kb, fan_in, fan_out):
        bound = 1.0 / math.sqrt(fan_in)
        w = jax.random.uniform(kw, (fan_in, fan_out), jnp.float32, -bound, bound)
        b = jax.random.uniform(kb, (1, fan_out), jnp.float32, -bound, bound)
        return w, b

    wk, bk = lin(ks[0], ks[1], D, K)
    wq, bq = lin(ks[2], ks[3], D, K)
    wv, bv = lin(ks[4], ks[5], D, D)
    wb, bb = lin(ks[6], ks[7], D, 1)
    w1, b1 = lin(ks[8], ks[9], D, D)
    return {
        "wk": wk, "bk": bk, "wq": wq, "bq": bq,
        "wv": wv, "bv": bv, "wb": wb, "bb": bb,
        "w1": w1, "b1": b1,
        "g1": jnp.ones((1, D), jnp.float32),    # LayerNorm default affine
        "beta1": jnp.zeros((1, D), jnp.float32),
    }


if __name__ == "__main__":
    B, S, D, K = 2, 8, 32, 4

    root = jax.random.PRNGKey(0)
    k_x, k_m, k_p = jax.random.split(root, 3)

    x = jax.random.normal(k_x, (B, S, D), jnp.float32)
    mask = (jax.random.uniform(k_m, (B, S)) > 0.25).astype(jnp.float32)
    params = init_params(k_p, D, K)

    out = self_attention_pallas(x, mask, params, key_size=K)
    out = jax.block_until_ready(out)
    assert out.shape == (B, S, D)

    # Tight check against a plain-JAX model of the exact kernel math (same bf16 casts).
    ref_bf16 = self_attention_bf16_reference(x, mask, params, key_size=K)
    err_tight = float(jnp.max(jnp.abs(out - ref_bf16)))
    assert err_tight < 5e-3, err_tight

    # Looser sanity check against the full-f32 PyTorch-equivalent reference.
    ref_f32 = self_attention_reference(x, mask, params, key_size=K)
    err_f32 = float(jnp.max(jnp.abs(out - ref_f32)))
    assert err_f32 < 1e-1, err_f32

    print("KERNEL_OK")
</pallas_src>

<mosaic_0001>
module attributes {stable_mosaic.version = 11 : i64} {
  func.func @self_attention_kernel(%arg0: i32, %arg1: memref<8x32xf32, #tpu.memory_space<vmem>>, %arg2: memref<8x1xf32, #tpu.memory_space<vmem>>, %arg3: memref<8x8xf32, #tpu.memory_space<vmem>>, %arg4: memref<32x384xbf16, #tpu.memory_space<vmem>>, %arg5: memref<1x384xf32, #tpu.memory_space<vmem>>, %arg6: memref<32x32xbf16, #tpu.memory_space<vmem>>, %arg7: memref<1x32xf32, #tpu.memory_space<vmem>>, %arg8: memref<1x32xf32, #tpu.memory_space<vmem>>, %arg9: memref<1x32xf32, #tpu.memory_space<vmem>>, %arg10: memref<8x32xf32, #tpu.memory_space<vmem>>) attributes {dimension_semantics = [#tpu.dimension_semantics<parallel>], iteration_bounds = array<i64: 2>, scalar_prefetch = 0 : i64, scratch_operands = 0 : i64, tpu.core_type = #tpu.core_type<tc>, window_params = [{transform_indices = @transform_0, window_bounds = array<i64: 8, 32>}, {transform_indices = @transform_1, window_bounds = array<i64: 8, 1>}, {pipeline_mode = #tpu.pipeline_mode<synchronous>, transform_indices = @transform_2, window_bounds = array<i64: 8, 8>}, {pipeline_mode = #tpu.pipeline_mode<synchronous>, transform_indices = @transform_3, window_bounds = array<i64: 32, 384>}, {pipeline_mode = #tpu.pipeline_mode<synchronous>, transform_indices = @transform_4, window_bounds = array<i64: 1, 384>}, {pipeline_mode = #tpu.pipeline_mode<synchronous>, transform_indices = @transform_5, window_bounds = array<i64: 32, 32>}, {pipeline_mode = #tpu.pipeline_mode<synchronous>, transform_indices = @transform_6, window_bounds = array<i64: 1, 32>}, {pipeline_mode = #tpu.pipeline_mode<synchronous>, transform_indices = @transform_7, window_bounds = array<i64: 1, 32>}, {pipeline_mode = #tpu.pipeline_mode<synchronous>, transform_indices = @transform_8, window_bounds = array<i64: 1, 32>}, {transform_indices = @transform_9, window_bounds = array<i64: 8, 32>}]} {
    %c0 = arith.constant 0 : index
    %c0_0 = arith.constant 0 : index
    %0 = vector.load %arg1[%c0, %c0_0] : memref<8x32xf32, #tpu.memory_space<vmem>>, vector<8x32xf32>
    %1 = arith.truncf %0 : vector<8x32xf32> to vector<8x32xbf16>
    %c0_1 = arith.constant 0 : index
    %c0_2 = arith.constant 0 : index
    %2 = vector.load %arg4[%c0_1, %c0_2] : memref<32x384xbf16, #tpu.memory_space<vmem>>, vector<32x384xbf16>
    %cst = arith.constant dense<0.000000e+00> : vector<8x384xf32>
    %3 = tpu.matmul %1, %2, %cst {dimension_numbers = #tpu.dot_dimension_numbers<[1], [0], [0], [1], [0, 0, 1, 1], [], []>} : vector<8x32xbf16>, vector<32x384xbf16>, vector<8x384xf32> -> vector<8x384xf32>
    %c0_3 = arith.constant 0 : index
    %c0_4 = arith.constant 0 : index
    %4 = vector.load %arg5[%c0_3, %c0_4] : memref<1x384xf32, #tpu.memory_space<vmem>>, vector<1x384xf32>
    %5 = vector.broadcast %4 : vector<1x384xf32> to vector<8x384xf32>
    %6 = arith.addf %3, %5 : vector<8x384xf32>
    %7 = vector.extract_strided_slice %6 {offsets = [0, 0], sizes = [8, 128], strides = [1, 1]} : vector<8x384xf32> to vector<8x128xf32>
    %8 = vector.extract_strided_slice %6 {offsets = [0, 128], sizes = [8, 128], strides = [1, 1]} : vector<8x384xf32> to vector<8x128xf32>
    %9 = vector.extract_strided_slice %6 {offsets = [0, 256], sizes = [8, 32], strides = [1, 1]} : vector<8x384xf32> to vector<8x32xf32>
    %10 = arith.truncf %7 : vector<8x128xf32> to vector<8x128xbf16>
    %11 = arith.truncf %8 : vector<8x128xf32> to vector<8x128xbf16>
    "tpu.trace_start"() <{level = 10 : i32, message = "qc,kc->qk"}> : () -> ()
    %cst_5 = arith.constant dense<0.000000e+00> : vector<8x8xf32>
    %12 = tpu.matmul %10, %11, %cst_5 {dimension_numbers = #tpu.dot_dimension_numbers<[1], [1], [0], [0], [0, 0, 1, 0], [], []>} : vector<8x128xbf16>, vector<8x128xbf16>, vector<8x8xf32> -> vector<8x8xf32>
    "tpu.trace_stop"() : () -> ()
    %13 = arith.negf %12 : vector<8x8xf32>
    %14 = math.exp %13 : vector<8x8xf32>
    %cst_6 = arith.constant 1.000000e+00 : f32
    %15 = vector.broadcast %cst_6 : f32 to vector<8x8xf32>
    %16 = arith.addf %15, %14 : vector<8x8xf32>
    %17 = arith.divf %15, %16 : vector<8x8xf32>
    %c0_7 = arith.constant 0 : index
    %c0_8 = arith.constant 0 : index
    %18 = vector.load %arg3[%c0_7, %c0_8] : memref<8x8xf32, #tpu.memory_space<vmem>>, vector<8x8xf32>
    %19 = arith.mulf %17, %18 : vector<8x8xf32>
    %c0_9 = arith.constant 0 : index
    %c0_10 = arith.constant 0 : index
    %20 = vector.load %arg2[%c0_9, %c0_10] : memref<8x1xf32, #tpu.memory_space<vmem>>, vector<8x1xf32>
    %21 = vector.broadcast %20 : vector<8x1xf32> to vector<8x32xf32>
    %22 = arith.mulf %9, %21 : vector<8x32xf32>
    %23 = arith.truncf %19 : vector<8x8xf32> to vector<8x8xbf16>
    %24 = arith.truncf %22 : vector<8x32xf32> to vector<8x32xbf16>
    %cst_11 = arith.constant dense<0.000000e+00> : vector<8x32xf32>
    %25 = tpu.matmul %23, %24, %cst_11 {dimension_numbers = #tpu.dot_dimension_numbers<[1], [0], [0], [1], [0, 0, 1, 1], [], []>} : vector<8x8xbf16>, vector<8x32xbf16>, vector<8x32xf32> -> vector<8x32xf32>
    %26 = arith.addf %0, %25 : vector<8x32xf32>
    %cst_12 = arith.constant dense<0.000000e+00> : vector<8xf32>
    %27 = vector.multi_reduction <add>, %26, %cst_12 [1] : vector<8x32xf32> to vector<8xf32>
    %28 = vector.shape_cast %27 : vector<8xf32> to vector<8x1xf32>
    %cst_13 = arith.constant 3.200000e+01 : f32
    %29 = vector.broadcast %cst_13 : f32 to vector<8x1xf32>
    %30 = arith.divf %28, %29 : vector<8x1xf32>
    %31 = arith.mulf %26, %26 : vector<8x32xf32>
    %cst_14 = arith.constant dense<0.000000e+00> : vector<8xf32>
    %32 = vector.multi_reduction <add>, %31, %cst_14 [1] : vector<8x32xf32> to vector<8xf32>
    %33 = vector.shape_cast %32 : vector<8xf32> to vector<8x1xf32>
    %cst_15 = arith.constant 3.200000e+01 : f32
    %34 = vector.broadcast %cst_15 : f32 to vector<8x1xf32>
    %35 = arith.divf %33, %34 : vector<8x1xf32>
    %36 = arith.mulf %30, %30 : vector<8x1xf32>
    %37 = arith.subf %35, %36 : vector<8x1xf32>
    %cst_16 = arith.constant 0.000000e+00 : f32
    %38 = vector.broadcast %cst_16 : f32 to vector<8x1xf32>
    %39 = arith.maximumf %37, %38 : vector<8x1xf32>
    %40 = vector.broadcast %30 : vector<8x1xf32> to vector<8x32xf32>
    %41 = arith.subf %26, %40 : vector<8x32xf32>
    %cst_17 = arith.constant 9.99999974E-6 : f32
    %42 = vector.broadcast %cst_17 : f32 to vector<8x1xf32>
    %43 = arith.addf %39, %42 : vector<8x1xf32>
    %44 = math.rsqrt %43 : vector<8x1xf32>
    %45 = vector.broadcast %44 : vector<8x1xf32> to vector<8x32xf32>
    %46 = arith.mulf %41, %45 : vector<8x32xf32>
    %c0_18 = arith.constant 0 : index
    %c0_19 = arith.constant 0 : index
    %47 = vector.load %arg8[%c0_18, %c0_19] : memref<1x32xf32, #tpu.memory_space<vmem>>, vector<1x32xf32>
    %48 = vector.broadcast %47 : vector<1x32xf32> to vector<8x32xf32>
    %49 = arith.mulf %46, %48 : vector<8x32xf32>
    %c0_20 = arith.constant 0 : index
    %c0_21 = arith.constant 0 : index
    %50 = vector.load %arg9[%c0_20, %c0_21] : memref<1x32xf32, #tpu.memory_space<vmem>>, vector<1x32xf32>
    %51 = vector.broadcast %50 : vector<1x32xf32> to vector<8x32xf32>
    %52 = arith.addf %49, %51 : vector<8x32xf32>
    %53 = arith.truncf %52 : vector<8x32xf32> to vector<8x32xbf16>
    %c0_22 = arith.constant 0 : index
    %c0_23 = arith.constant 0 : index
    %54 = vector.load %arg6[%c0_22, %c0_23] : memref<32x32xbf16, #tpu.memory_space<vmem>>, vector<32x32xbf16>
    %cst_24 = arith.constant dense<0.000000e+00> : vector<8x32xf32>
    %55 = tpu.matmul %53, %54, %cst_24 {dimension_numbers = #tpu.dot_dimension_numbers<[1], [0], [0], [1], [0, 0, 1, 1], [], []>} : vector<8x32xbf16>, vector<32x32xbf16>, vector<8x32xf32> -> vector<8x32xf32>
    %c0_25 = arith.constant 0 : index
    %c0_26 = arith.constant 0 : index
    %56 = vector.load %arg7[%c0_25, %c0_26] : memref<1x32xf32, #tpu.memory_space<vmem>>, vector<1x32xf32>
    %57 = vector.broadcast %56 : vector<1x32xf32> to vector<8x32xf32>
    %58 = arith.addf %55, %57 : vector<8x32xf32>
    %cst_27 = arith.constant 0.000000e+00 : f32
    %59 = vector.broadcast %cst_27 : f32 to vector<8x32xf32>
    %60 = arith.maximumf %58, %59 : vector<8x32xf32>
    %61 = arith.addf %52, %60 : vector<8x32xf32>
    %cst_28 = arith.constant dense<0.000000e+00> : vector<8xf32>
    %62 = vector.multi_reduction <add>, %61, %cst_28 [1] : vector<8x32xf32> to vector<8xf32>
    %63 = vector.shape_cast %62 : vector<8xf32> to vector<8x1xf32>
    %cst_29 = arith.constant 3.200000e+01 : f32
    %64 = vector.broadcast %cst_29 : f32 to vector<8x1xf32>
    %65 = arith.divf %63, %64 : vector<8x1xf32>
    %66 = arith.mulf %61, %61 : vector<8x32xf32>
    %cst_30 = arith.constant dense<0.000000e+00> : vector<8xf32>
    %67 = vector.multi_reduction <add>, %66, %cst_30 [1] : vector<8x32xf32> to vector<8xf32>
    %68 = vector.shape_cast %67 : vector<8xf32> to vector<8x1xf32>
    %cst_31 = arith.constant 3.200000e+01 : f32
    %69 = vector.broadcast %cst_31 : f32 to vector<8x1xf32>
    %70 = arith.divf %68, %69 : vector<8x1xf32>
    %71 = arith.mulf %65, %65 : vector<8x1xf32>
    %72 = arith.subf %70, %71 : vector<8x1xf32>
    %cst_32 = arith.constant 0.000000e+00 : f32
    %73 = vector.broadcast %cst_32 : f32 to vector<8x1xf32>
    %74 = arith.maximumf %72, %73 : vector<8x1xf32>
    %75 = vector.broadcast %65 : vector<8x1xf32> to vector<8x32xf32>
    %76 = arith.subf %61, %75 : vector<8x32xf32>
    %cst_33 = arith.constant 9.99999974E-6 : f32
    %77 = vector.broadcast %cst_33 : f32 to vector<8x1xf32>
    %78 = arith.addf %74, %77 : vector<8x1xf32>
    %79 = math.rsqrt %78 : vector<8x1xf32>
    %80 = vector.broadcast %79 : vector<8x1xf32> to vector<8x32xf32>
    %81 = arith.mulf %76, %80 : vector<8x32xf32>
    %c0_34 = arith.constant 0 : index
    %c0_35 = arith.constant 0 : index
    %82 = vector.load %arg10[%c0_34, %c0_35] : memref<8x32xf32, #tpu.memory_space<vmem>>, vector<8x32xf32>
    tpu.vector_store %arg10[%c0_34, %c0_35], %81 {strides = array<i32>} : memref<8x32xf32, #tpu.memory_space<vmem>>, vector<8x32xf32>,
    return
  }
  func.func @transform_0(%arg0: i32) -> (i32, i32) {
    %c0_i32 = arith.constant 0 : i32
    %c0_i32_0 = arith.constant 0 : i32
    return %arg0, %c0_i32 : i32, i32
  }
  func.func @transform_1(%arg0: i32) -> (i32, i32) {
    %c0_i32 = arith.constant 0 : i32
    %c0_i32_0 = arith.constant 0 : i32
    return %arg0, %c0_i32 : i32, i32
  }
  func.func @transform_2(%arg0: i32) -> (i32, i32) {
    %c0_i32 = arith.constant 0 : i32
    %c0_i32_0 = arith.constant 0 : i32
    %c0_i32_1 = arith.constant 0 : i32
    return %c0_i32, %c0_i32_0 : i32, i32
  }
  func.func @transform_3(%arg0: i32) -> (i32, i32) {
    %c0_i32 = arith.constant 0 : i32
    %c0_i32_0 = arith.constant 0 : i32
    %c0_i32_1 = arith.constant 0 : i32
    return %c0_i32, %c0_i32_0 : i32, i32
  }
  func.func @transform_4(%arg0: i32) -> (i32, i32) {
    %c0_i32 = arith.constant 0 : i32
    %c0_i32_0 = arith.constant 0 : i32
    %c0_i32_1 = arith.constant 0 : i32
    return %c0_i32, %c0_i32_0 : i32, i32
  }
  func.func @transform_5(%arg0: i32) -> (i32, i32) {
    %c0_i32 = arith.constant 0 : i32
    %c0_i32_0 = arith.constant 0 : i32
    %c0_i32_1 = arith.constant 0 : i32
    return %c0_i32, %c0_i32_0 : i32, i32
  }
  func.func @transform_6(%arg0: i32) -> (i32, i32) {
    %c0_i32 = arith.constant 0 : i32
    %c0_i32_0 = arith.constant 0 : i32
    %c0_i32_1 = arith.constant 0 : i32
    return %c0_i32, %c0_i32_0 : i32, i32
  }
  func.func @transform_7(%arg0: i32) -> (i32, i32) {
    %c0_i32 = arith.constant 0 : i32
    %c0_i32_0 = arith.constant 0 : i32
    %c0_i32_1 = arith.constant 0 : i32
    return %c0_i32, %c0_i32_0 : i32, i32
  }
  func.func @transform_8(%arg0: i32) -> (i32, i32) {
    %c0_i32 = arith.constant 0 : i32
    %c0_i32_0 = arith.constant 0 : i32
    %c0_i32_1 = arith.constant 0 : i32
    return %c0_i32, %c0_i32_0 : i32, i32
  }
  func.func @transform_9(%arg0: i32) -> (i32, i32) {
    %c0_i32 = arith.constant 0 : i32
    %c0_i32_0 = arith.constant 0 : i32
    return %arg0, %c0_i32 : i32, i32
  }
}

</mosaic_0001>

<bundles_post_ra>
// kernel: tpu_custom_call.1
= control target key start
LH: loop header
LB: loop body
LE: loop exit
PB: predicated region body
PF: predicated region fallthrough
CT: control target
= control target key end

     0   :  { %14 = vsyncpa [#allocation3], 0  ;;  %s1498_s0 = inlined_call_operand.vmem [shape: f32[16,32], index: 0, kind: input, shape index: {}]   ;;  %s1499_s1 = inlined_call_operand.vmem [shape: f32[16,1], index: 1, kind: input, shape index: {}]   ;;  %s1500_s2 = inlined_call_operand.hbm [shape: f32[8,8], index: 2, kind: input, shape index: {}]   ;;  %s1501_s3 = inlined_call_operand.hbm [shape: bf16[32,384], index: 3, kind: input, shape index: {}]   ;;  %s1502_s4 = inlined_call_operand.hbm [shape: f32[1,384], index: 4, kind: input, shape index: {}]   ;;  %s1503_s5 = inlined_call_operand.vmem [shape: bf16[32,32], index: 5, kind: input, shape index: {}]   ;;  %s1504_s6 = inlined_call_operand.vmem [shape: f32[1,32], index: 6, kind: input, shape index: {}]   ;;  %s1505_s7 = inlined_call_operand.vmem [shape: f32[1,32], index: 7, kind: input, shape index: {}]   ;;  %s1506_s8 = inlined_call_operand.vmem [shape: f32[1,32], index: 8, kind: input, shape index: {}]   ;;  %s1507_s9 = inlined_call_operand.hbm [shape: f32[16,32], index: 9, kind: output, shape index: {}]  }
   0x1   :  { %15 = vsyncpa [#allocation6], 0 }
   0x2   :  { %16 = vsyncpa [#allocation4], 0 }
   0x3   :  { %18 = vsyncpa [#allocation4 + $0x1], 0  ;;  %s1253_s30 = smov 0   ;;  %s1255_s10 = smov 0  }
   0x4   :  { %s1257_s11 = smov 0   ;;  %s1259_s12 = smov 0  }
   0x5 LB: > { %1516 = sst [smem:[#allocation12_spill]] %s1180_s30  ;;  %s1274_s13 = sadd.s32 4294967295, %s1192_s12   ;;  %s1192_s12 = sphi %s1259_s12, %s1535_s12   ;;  %s1188_s11 = sphi %s1257_s11, %s1537_s11   ;;  %s1184_s10 = sphi %s1255_s10, %s1539_s10   ;;  %s1180_s30 = sphi %s1253_s30, %s1538_s30  }
   0x6   : > { %1517 = sst [smem:[#allocation13_spill]] %s1188_s11  ;;  %s873_s14 = sadd.s32 4294967294, %s1192_s12  }
   0x7   : > { %s1278_s15 = sadd.s32 1, %s1192_s12   ;;  %s230_s16 = sadd.s32 1, %s1188_s11 }
   0x8   : > { %1518 = sst [smem:[#allocation14_spill]] %s1278_s15  ;;  %s227_s17 = ssub.s32 %s1192_s12, %s1278_s15 }
   0x9   : > { %p240_p0 = scmp.ne.s32.totalorder %s1188_s11, %s1184_s10  ;;  %p228_p1 = scmp.eq.s32.totalorder %s227_s17, 0 }
   0xa   : > { %p241_p2 = scmp.eq.s32.totalorder %s1274_s13, 1  ;;  %p246_p3 = scmp.ne.s32.totalorder %s1184_s10, %s1180_s30 }
   0xb   : > { %p247_p4 = scmp.eq.s32.totalorder %s873_s14, 1  ;;  %p874_p7 = scmp.ge.s32.totalorder %s1192_s12, 1 }
   0xc   : > { %s1289_s18 = scalar_select %p228_p1, %s1188_s11, %s230_s16  }
   0xd   : > { %p1291_p5 = por %p241_p2, %p240_p0  ;;  %p1295_p6 = por %p247_p4, %p246_p3 }
   0xe   : > { %1519 = sst [smem:[#allocation15_spill]] %s1289_s18  ;;  %p254_p8 = scmp.lt.s32.totalorder %s1192_s12, 3 }
   0xf   : > { %s1520_s19 = scalar_select %p1291_p5, 1, 0 }
  0x10   : > { %s1521_s20 = scalar_select %p1295_p6, 1, 0 }
  0x11   : > { %p1508_p9 = scmp.eq.s32.totalorder %s1274_s13, 0  ;;  %p1302_p10 = pnand %p874_p7, %p254_p8 }
  0x12   : > { %1522 = sst [smem:[#allocation16_spill]] %s1521_s20  ;;  %s1194_s22 = smov [#allocation5]  }
  0x13   : > { %s1523_s21 = scalar_select %p1302_p10, 1, 0 }
  0x14   : > { %s277_s23 = sshll.u32 %s1194_s22, 4  ;;  %p958_p11 = pneg %p1302_p10  ;;  %s1308_s23 = int_to_ptr.vmem [resolvable:$true] %s277_s23 }
  0x15   : > { %s1195_s25 = smov [#allocation2]   ;;  %s1196_s27 = smov [#allocation7]  }
  0x16   : > { %p1312_p12 = pnand %p1508_p9, %p958_p11  ;;  %s267_s26 = sshll.u32 %s1195_s25, 4  ;;  %s1316_s26 = int_to_ptr.vmem [resolvable:$true] %s267_s26 }
  0x17   : > { %s1318_s28 = sshll.u32 %s1196_s27, 4  ;;  %s1038_s16 = scalar_lea.hbm %s1501_s3, 768  ;;  %s292_s28 = int_to_ptr.vmem [resolvable:$true] %s1318_s28 }
  0x18   : > { %p1039_p13 = scmp.ne.s32.totalorder %s1501_s3, %s1038_s16  ;;  %p1328_p0 = pneg %p1312_p12 }
  0x19   : > { %p1045_p3 = scmp.lt.u32.totalorder %s1038_s16, %s1501_s3 }
  0x1a   : > { %p1041_p1 = pnand %p1328_p0, %p1039_p13 }
  0x1c   : > { %p1042_p2 = pneg %p1041_p1 }
  0x1e   : > { %p1047_p4 = pnand %p1045_p3, %p1042_p2 }
  0x20   : > { %1050 = shalt.err (!%p1047_p4)
}
  0x21   : > { %s1051_s29 = scalar_lea.vmem %s1308_s23, 768  ;;  %p1059_p9 = scmp.lt.s32.totalorder %s1308_s23, %s1308_s23 }
  0x22   : > { %p1052_p7 = scmp.ne.s32.totalorder %s1308_s23, %s1051_s29  ;;  %p1060_p6 = scmp.lt.s32.totalorder %s1051_s29, %s1051_s29 }
  0x24   : > { %p1054_p8 = pnand %p1052_p7, %p1328_p0  ;;  %p1061_p13 = por %p1060_p6, %p1059_p9 }
  0x26   : > { %p1055_p11 = pneg %p1054_p8 }
  0x28   : > { %p1062_p1 = pnand %p1061_p13, %p1055_p11 }
  0x2a   : > { %1065 = shalt.err (!%p1062_p1)
}
  0x2b   : > { %s1197_s14 = smov 192   ;;  %s1198_s16 = smov 12  }
  0x2c   : > { %964 = dma.hbm_to_vmem [thread:$0]  (!%p1312_p12), %s1501_s3, 768, %s1308_s23, [#allocation6], %s1197_s14, %s1197_s14, %s1198_s16  }
  0x2d   : > { %s1066_s11 = scalar_lea.hbm %s1500_s2, 128 }
  0x2e   : > { %p1067_p6 = scmp.ne.s32.totalorder %s1500_s2, %s1066_s11  ;;  %p1073_p3 = scmp.lt.u32.totalorder %s1066_s11, %s1500_s2 }
  0x30   : > { %p1069_p9 = pnand %p1067_p6, %p1328_p0 }
  0x32   : > { %p1070_p2 = pneg %p1069_p9 }
  0x34   : > { %p1075_p4 = pnand %p1073_p3, %p1070_p2 }
  0x36   : > { %1078 = shalt.err (!%p1075_p4)
}
  0x37   : > { %s1079_s23 = scalar_lea.vmem %s1316_s26, 128  ;;  %p1087_p13 = scmp.lt.s32.totalorder %s1316_s26, %s1316_s26 }
  0x38   : > { %p1080_p7 = scmp.ne.s32.totalorder %s1316_s26, %s1079_s23  ;;  %p1088_p1 = scmp.lt.s32.totalorder %s1079_s23, %s1079_s23 }
  0x3a   : > { %p1082_p8 = pnand %p1080_p7, %p1328_p0  ;;  %p1089_p6 = por %p1088_p1, %p1087_p13 }
  0x3c   : > { %p1083_p11 = pneg %p1082_p8 }
  0x3e   : > { %p1090_p9 = pnand %p1089_p6, %p1083_p11 }
  0x40   : > { %1093 = shalt.err (!%p1090_p9)
}
  0x41   : > { %961 = dma.hbm_to_vmem [thread:$0]  (!%p1312_p12), %s1500_s2, 128, %s1316_s26, [#allocation3]  }
  0x42   : > { %s1094_s14 = scalar_lea.hbm %s1502_s4, 48 }
  0x43   : > { %p1095_p2 = scmp.ne.s32.totalorder %s1502_s4, %s1094_s14  ;;  %p1101_p7 = scmp.lt.u32.totalorder %s1094_s14, %s1502_s4 }
  0x45   : > { %p1097_p3 = pnand %p1095_p2, %p1328_p0 }
  0x47   : > { %p1098_p4 = pneg %p1097_p3 }
  0x49   : > { %p1103_p8 = pnand %p1101_p7, %p1098_p4 }
  0x4b   : > { %1106 = shalt.err (!%p1103_p8)
}
  0x4c   : > { %s1107_s27 = scalar_lea.vmem %s292_s28, 48  ;;  %s1114_s26 = scalar_lea.vmem %s292_s28, 64 }
  0x4d   : > { %p1108_p11 = scmp.ne.s32.totalorder %s292_s28, %s1107_s27  ;;  %p1115_p6 = scmp.lt.s32.totalorder %s292_s28, %s292_s28 }
  0x4e   : > { %p1116_p9 = scmp.lt.s32.totalorder %s1114_s26, %s1107_s27 }
  0x4f   : > { %p1110_p13 = pnand %p1108_p11, %p1328_p0 }
  0x50   : > { %p1117_p5 = por %p1116_p9, %p1115_p6 }
  0x51   : > { %p1111_p1 = pneg %p1110_p13 }
  0x53   : > { %p1118_p10 = pnand %p1117_p5, %p1111_p1 }
  0x55   : > { %1121 = shalt.err (!%p1118_p10)
}
  0x56   : > { %967 = dma.hbm_to_vmem [thread:$0]  (!%p1312_p12), %s1502_s4, 48, %s292_s28, [#allocation6]  }
  0x57   : > { %p1526_p2 = scmp.ne.s32.totalorder %s1523_s21, 0 }
  0x58   : > { %p1527_p3 = scmp.eq.s32.totalorder (!%p1526_p2), %s1274_s13, 0 }
  0x59   : > { %330 = sbr.rel (%p1526_p2) target bundleno = 1363 (0x553), region = 56 }
  0x60   : > { %1167 = dma.done.wait (%p1527_p3), [#allocation3], 128   ;;  %p1528_p0 = pmov %p1527_p3 }
  0x62   : > { %1169 = vsyncadd (%p1528_p0), [#allocation3], 4294967168  ;;  %p1529_p4 = pmov %p1528_p0 }
  0x63   : > { %p1530_p5 = pmov %p1528_p0 }
  0x64   : > { %1171 = dma.done.wait (%p1529_p4), [#allocation6], 816  }
  0x65   : > { %1173 = vsyncadd (%p1530_p5), [#allocation6], 4294966480  ;;  %p377_p10 = scmp.lt.s32.totalorder %s1274_s13, 1  ;;  %v1199_v0 = vmov 0   ;;  %v1020_v1 = vld [vmem:[#allocation5 + $0x4] ss:$12 sps:$4 sm:$0xff]   ;;  %v398_v11 = vlaneseq }
  0x66   : > { %481 = vmatprep.mubr.bf16.mxu0 %v1199_v0  ;;  %1019 = vset.pattern.permute.xlu0 %v1199_v0  ;;  %v1022_v2 = vld [vmem:[#allocation5] ss:$12 sps:$4 sm:$0xff]   ;;  %v1023_v3 = vld [vmem:[#allocation5 + $0x1c] ss:$12 sps:$4 sm:$0xff]   ;;  %v1025_v4 = vld [vmem:[#allocation5 + $0x18] ss:$12 sps:$4 sm:$0xff]  }
  0x67   : > { %s378_s18 = scalar_select %p377_p10, %s1274_s13, 1  ;;  %449 = vmatprep.subr.bf16.mxu0 %v1020_v1  ;;  %vm445_vm0 = vcmask 261120   ;;  %v1200_v7 = vmov 0.0   ;;  %vm1201_vm1 = vmmov 0   ;;  %v1026_v8 = vld [vmem:[#allocation5 + $0x8] ss:$12 sps:$4 sm:$0xff]  }
  0x68   : > { %450 = vmatpush1.bf16.msra.mxu0 %v1022_v2  ;;  %916 = vmatprep.subr.bf16.mxu1 %v1200_v7  ;;  %v1027_v10 = vld [vmem:[#allocation5 + $0x20] ss:$12 sps:$4 sm:$0xff]   ;;  %v399_v12 = vshrl.u32 %v398_v11, 7  ;;  %v396_v14 = vld [vmem:[#allocation7] sm:$0x7]  ;;  %vm593_vm2 = vcmask 1043456  }
  0x69   : > { %s884_s21 = sshll.u32 %s378_s18, 3  ;;  %451 = vmatprep.subr.bf16.mxu0 %v1023_v3  ;;  %920 = vmatprep.mubr.msk.bf16.mxu1 %vm1201_vm1, %v1200_v7  ;;  %v578_v44 = vld [vmem:[#allocation2] sm:$0xff]  ;;  %vm589_vm3 = vcmask 64512   ;;  %v1029_v57 = vld [vmem:[%s1503_s5 + $0x8] sm:$0xff]   ;;  %s903_s28 = sshll.u32 %s1274_s13, 7 }
  0x6a   : > { %s380_s30 = scalar_lea.vmem %s1498_s0, %s884_s21  ;;  %s384_s20 = scalar_lea.vmem %s1499_s1, %s884_s21  ;;  %917 = vmatpush3.bf16.msra.mxu1 %v1026_v8  ;;  %v404_v13 = vsub.s32 1, %v399_v12  ;;  %v400_v16 = vsub.s32 0, %v399_v12  ;;  %v408_v26 = vsub.s32 2, %v399_v12  ;;  %v1028_v56 = vld [vmem:[%s1503_s5] sm:$0xff]  }
  0x6b   : > { %v1406_v5 = vld [vmem:[%s380_s30] sm:$0xff]  ;;  %918 = vmatprep.subr.bf16.mxu1 %v1200_v7  ;;  %s374_s21 = sand.u32 1, %s1184_s10   ;;  %s1455_s14 = scalar_lea.hbm %s1507_s9, %s903_s28 }
  0x6c   : > { %v387_v6 = vpack.c.bf16 %v1406_v5, %v1406_v5  ;;  %452 = vmatpush1.bf16.msra.mxu0 %v1025_v4  ;;  %v580_v9 = vld [vmem:[%s384_s20] sm:$0xff]  ;;  %v405_v15 = vrot.slane %v396_v14, %v404_v13  ;;  %v401_v21 = vrot.slane %v396_v14, %v400_v16  ;;  %v409_v29 = vrot.slane %v396_v14, %v408_v26  ;;  %s883_s24 = sshll.u32 %s374_s21, 3  ;;  %s758_s16 = scalar_lea.sflag [#allocation4], %s374_s21 }
  0x6d   : > { %924 = vmatprep.subr.bf16.mxu0 %v1200_v7  ;;  %583 = vperm.xlu0 %1019, %v580_v9   ;;  %v896_v4 = vld [vmem:[%s1505_s7] ss:$0 sm:$0xff]  ;;  %s376_s30 = scalar_lea.vmem [#allocation8], %s883_s24  ;;  %p1531_p7 = scmp.ne.s32.totalorder %s1520_s19, 0 }
  0x6e   : > { %919 = vmatpush3.bf16.msra.mxu1 %v1027_v10  ;;  %v898_v10 = vld [vmem:[%s1504_s6] ss:$0 sm:$0xff]  ;;  %s771_s11 = sshll.u32 %s376_s30, 4  ;;  %s1202_s13 = smov [#allocation8]   ;;  %s1457_s11 = int_to_ptr.vmem [resolvable:$true] %s771_s11 }
  0x6f   : > { %892 = vmatmul.mubr.msk.bf16.vlgmr.msra.gmra.mrb[0].mxu0 %vm445_vm0, %v387_v6  ;;  %930 = vmatprep.subr.bf16.mxu1 %v1200_v7  ;;  %s1122_s17 = scalar_lea.vmem %s1457_s11, 128  ;;  %s1126_s22 = sshll.u32 %s1202_s13, 4  ;;  %s1127_s22 = int_to_ptr.vmem [resolvable:$false] %s1126_s22 }
  0x70   : > { %926 = vmatprep.mubr.msk.bf16.mxu0 %vm1201_vm1, %v1200_v7  ;;  %p1123_p12 = scmp.ne.s32.totalorder %s1457_s11, %s1122_s17  ;;  %s1128_s25 = scalar_lea.vmem %s1127_s22, 256 }
  0x71   : > { %921 = vmatmul.mubr.msk.bf16.vlgmr.msra.gmra.mrb[0].mxu1 %vm445_vm0, %v387_v6  ;;  %v897_v6 = vld [vmem:[%s1506_s8] ss:$0 sm:$0xff]  ;;  %p1129_p13 = scmp.lt.s32.totalorder %s1457_s11, %s1127_s22  ;;  %p1130_p1 = scmp.lt.s32.totalorder %s1128_s25, %s1122_s17 }
  0x72   : > { %932 = vmatprep.mubr.msk.bf16.mxu1 %vm1201_vm1, %v1200_v7  ;;  %p1124_p8 = pnand %p1123_p12, %p1531_p7 }
  0x73   : > { %p1131_p6 = por %p1130_p1, %p1129_p13 }
  0x74   : > { %p1125_p11 = pneg %p1124_p8 }
  0x76   : > { %p1132_p9 = pnand %p1131_p6, %p1125_p11 }
  0xec   : > { %v584_v32 = vpop.permute.xlu0 %583 }
 0x142   : > { %v483_v17 = vpop.f32.mrb[0].mxu0 }
 0x143   : > { %v485_v18 = vpop.f32.mrb[1].mxu0  ;;  %v484_v24 = vadd.f32 %v483_v17, %v401_v21 }
 0x144   : > { %v486_v19 = vadd.f32 %v485_v18, %v405_v15  ;;  %v487_v20 = vpop.f32.mrb[2].mxu0  ;;  %v524_v27 = vpop.f32.mrb[0].mxu1 }
 0x145   : > { %v488_v22 = vpop.f32.mrb[3].mxu0  ;;  %v530_v25 = vpack.c.bf16 %v484_v24, %v484_v24  ;;  %v922_v28 = vpop.f32.mrb[1].mxu1  ;;  %v525_v33 = vadd.f32 %v524_v27, %v409_v29 }
 0x146   : > { %v531_v23 = vpack.c.bf16 %v486_v19, %v486_v19  ;;  %v527_v30 = vpop.f32.mrb[2].mxu1 }
 0x147   : > { %v923_v31 = vpop.f32.mrb[3].mxu1  ;;  %v586_v34 = vmul.f32 %v584_v32, %v525_v33 }
 0x148   : > { %925 = vmatpush3.bf16.xpose.msra.mxu0 %v531_v23 }
 0x149   : > { %936 = vmatprep.subr.bf16.mxu0 %v1200_v7  ;;  %v588_v35 = vpack.c.bf16 %v586_v34, %v586_v34 }
 0x14b   : > { %v595_v36 = vsel %vm593_vm2, %v588_v35, 0 }
 0x14c   : > { %931 = vmatpush3.bf16.msra.mxu1 %v595_v36 }
 0x14f   : > { %927 = vmatmul.mubr.bf16.vlgmr.msra.gmra.mrb[4].mxu0 %v530_v25 }
 0x150   : > { %940 = vmatprep.mubr.msk.bf16.mxu0 %vm1201_vm1, %v1200_v7  ;;  %937 = vmatpush3.bf16.msra.mxu0 %v1028_v56 }
 0x151   : > { %938 = vmatprep.subr.bf16.mxu0 %v1200_v7 }
 0x154   : > { %939 = vmatpush3.bf16.msra.mxu0 %v1029_v57 }
 0x222   : > { %v566_v37 = vpop.f32.mrb[4].mxu0 }
 0x223   : > { %v894_v38 = vmul.f32 -1.442695, %v566_v37  ;;  %v928_v39 = vpop.f32.mrb[5].mxu0 }
 0x224   : > { %v569_v40 = vpop.f32.mrb[6].mxu0 }
 0x225   : > { %1030 = vpow2.f32 %v894_v38  ;;  %v929_v41 = vpop.f32.mrb[7].mxu0 }
 0x22f   : > { %v1031_v42 = vpop.eup %1030 }
 0x230   : > { %v575_v43 = vadd.f32 1.0, %v1031_v42 }
 0x232   : > { %1032 = vrcp.f32 %v575_v43 }
 0x23c   : > { %v1033_v45 = vpop.eup %1032 }
 0x23d   : > { %v579_v46 = vmul.f32 %v1033_v45, %v578_v44 }
 0x23f   : > { %v587_v47 = vpack.c.bf16 %v579_v46, %v579_v46 }
 0x241   : > { %933 = vmatmul.mubr.msk.bf16.vlgmr.msra.gmra.mrb[4].mxu1 %vm589_vm3, %v587_v47 }
 0x314   : > { %v631_v48 = vpop.f32.mrb[4].mxu1 }
 0x315   : > { %v637_v49 = vadd.f32 %v631_v48, %v1406_v5  ;;  %v934_v50 = vpop.f32.mrb[5].mxu1 }
 0x316   : > { %v634_v51 = vpop.f32.mrb[6].mxu1 }
 0x317   : > { %v935_v52 = vpop.f32.mrb[7].mxu1  ;;  %v638_v53 = vsel %vm445_vm0, %v637_v49, 0.0  ;;  %v643_v54 = vmul.f32 %v637_v49, %v637_v49 }
 0x318   : > { %639 = vadd.xlane.f32.xlu0 %v638_v53 }
 0x319   : > { %v644_v55 = vsel %vm445_vm0, %v643_v54, 0.0 }
 0x31a   : > { %645 = vadd.xlane.f32.xlu1 %v644_v55 }
 0x3a5   : > { %v640_v58 = vpop.xlane.xlu0 %639 }
 0x3a6   : > { %v642_v59 = vmul.f32 0.03125, %v640_v58 }
 0x3a7   : > { %v646_v60 = vpop.xlane.xlu1 %645 }
 0x3a8   : > { %v648_v61 = vmul.f32 %v642_v59, %v642_v59  ;;  %v647_v62 = vmul.f32 0.03125, %v646_v60  ;;  %v651_v2 = vsub.f32 %v637_v49, %v642_v59 }
 0x3aa   : > { %v649_v63 = vsub.f32 %v647_v62, %v648_v61 }
 0x3ac   : > { %v650_v0 = vmax.f32 %v649_v63, 0.0 }
 0x3ae   : > { %v652_v1 = vadd.f32 1e-05, %v650_v0 }
 0x3b0   : > { %1034 = vrsqrt.f32 %v652_v1 }
 0x3ba   : > { %v1035_v3 = vpop.eup %1034 }
 0x3bb   : > { %v654_v5 = vmul.f32 %v1035_v3, %v651_v2 }
 0x3bd   : > { %v662_v7 = vmul.f32 %v896_v4, %v654_v5 }
 0x3bf   : > { %v670_v8 = vadd.f32 %v897_v6, %v662_v7 }
 0x3c1   : > { %v671_v9 = vpack.c.bf16 %v670_v8, %v670_v8 }
 0x3c3   : > { %941 = vmatmul.mubr.msk.bf16.vlgmr.msra.gmra.mrb[8].mxu0 %vm445_vm0, %v671_v9 }
 0x496   : > { %v732_v11 = vpop.f32.mrb[8].mxu0 }
 0x497   : > { %v733_v12 = vadd.f32 %v898_v10, %v732_v11  ;;  %v942_v13 = vpop.f32.mrb[9].mxu0 }
 0x498   : > { %v735_v14 = vpop.f32.mrb[10].mxu0 }
 0x499   : > { %v738_v15 = vmax.f32 %v733_v12, 0.0  ;;  %v943_v16 = vpop.f32.mrb[11].mxu0 }
 0x49b   : > { %v739_v17 = vadd.f32 %v738_v15, %v670_v8 }
 0x49d   : > { %v740_v18 = vsel %vm445_vm0, %v739_v17, 0.0  ;;  %v744_v19 = vmul.f32 %v739_v17, %v739_v17 }
 0x49e   : > { %741 = vadd.xlane.f32.xlu1 %v740_v18 }
 0x49f   : > { %v745_v20 = vsel %vm445_vm0, %v744_v19, 0.0 }
 0x4a2   : > { %746 = vadd.xlane.f32.xlu1 %v745_v20 }
 0x52b   : > { %v742_v21 = vpop.xlane.xlu1 %741 }
 0x52c   : > { %v743_v22 = vmul.f32 0.03125, %v742_v21 }
 0x52e   : > { %v749_v24 = vmul.f32 %v743_v22, %v743_v22  ;;  %v752_v29 = vsub.f32 %v739_v17, %v743_v22 }
 0x52f   : > { %v747_v23 = vpop.xlane.xlu1 %746 }
 0x530   : > { %v748_v25 = vmul.f32 0.03125, %v747_v23 }
 0x532   : > { %v750_v26 = vsub.f32 %v748_v25, %v749_v24 }
 0x534   : > { %v751_v27 = vmax.f32 %v750_v26, 0.0 }
 0x536   : > { %v753_v28 = vadd.f32 1e-05, %v751_v27 }
 0x538   : > { %1036 = vrsqrt.f32 %v753_v28 }
 0x542   : > { %v1037_v30 = vpop.eup %1036 }
 0x543   : > { %v755_v31 = vmul.f32 %v1037_v30, %v752_v29 }
 0x545   : > { %756 = vst.msk [vmem:[%s376_s30] sm:$0xff] %vm445_vm0, %v755_v31 }
 0x546   : > { %1135 = shalt.err (!%p1132_p9)
}
 0x547   : > { %s1136_s27 = scalar_lea.hbm %s1455_s14, 128  ;;  %s1140_s23 = scalar_lea.hbm %s1507_s9, 256 }
 0x548   : > { %p1137_p2 = scmp.ne.s32.totalorder %s1455_s14, %s1136_s27  ;;  %p1141_p4 = scmp.lt.u32.totalorder %s1455_s14, %s1507_s9 }
 0x549   : > { %p1142_p5 = scmp.lt.u32.totalorder %s1140_s23, %s1136_s27  ;;  %p1144_p12 = scmp.lt.u32.totalorder %s1136_s27, %s1455_s14 }
 0x54a   : > { %p1138_p3 = pnand %p1137_p2, %p1531_p7 }
 0x54b   : > { %p1143_p10 = por %p1142_p5, %p1141_p4 }
 0x54c   : > { %p1139_p0 = pneg %p1138_p3 }
 0x54d   : > { %p1145_p8 = por %p1144_p12, %p1143_p10 }
 0x54f   : > { %p1146_p11 = pnand %p1145_p8, %p1139_p0 }
 0x551   : > { %1149 = shalt.err (!%p1146_p11)
}
 0x552   : > { %956 = dma.vmem_to_hbm [thread:$0]  (%p1531_p7), %s1457_s11, 128, %s1455_s14, %s758_s16  }
 0x553 PF: > { %s1532_s24 = sld [smem:[#allocation12_spill]]  ;;  %s1533_s28 = sld [smem:[#allocation16_spill]] }
 0x554   : > { %p978_p13 = scmp.ge.s32.totalorder %s1192_s12, 2 }
 0x559   : > { %s783_s30 = sand.u32 1, %s1532_s24   ;;  %p1534_p1 = scmp.ne.s32.totalorder %s1533_s28, 0 }
 0x55a   : > { %s784_s15 = scalar_lea.sflag [#allocation4], %s783_s30 }
 0x55b   : > { %p969_p6 = pnand %p978_p13, %p1534_p1 }
 0x55d   : > { %1175 = dma.done.wait (!%p969_p6), %s784_s15, 128  }
 0x55e   : > { %1177 = vsyncadd (!%p969_p6), %s784_s15, 4294967168  ;;  %s1535_s12 = sld [smem:[#allocation14_spill]]  ;;  %s1536_s20 = sld [smem:[#allocation13_spill]] }
 0x55f   : > { %s1537_s11 = sld [smem:[#allocation15_spill]]  ;;  %s1538_s30 = smov %s1184_s10 }
 0x564   : > { %p21_p9 = scmp.ge.s32.totalorder %s1535_s12, 4   ;;  %s1539_s10 = smov %s1536_s20 }
 0x566   :  { %23 = sbr.rel (!%p21_p9) target bundleno = 5 (0x5), region = 107 }
 0x56d   :  { %789 = vsyncpa [#allocation3], 1 }
 0x56e   :  { %791 = vsyncpa [#allocation3 + $0x1], 1 }
 0x56f   :  { %792 = vsyncpa [#allocation6], 1 }
 0x570   :  { %793 = vsyncpa [#allocation4], 1 }
 0x571   :  { %795 = vsyncpa [#allocation4 + $0x1], 1 }

</bundles_post_ra>
